<compile_context>
chip_gen: v7x
topology: tpu7x:2x2x1
jax: 0.10.0
libtpu: 0.0.40
codegen_flags: <defaults>
</compile_context>

<pallas_src>
import numpy as np
import jax
import jax.numpy as jnp
from jax.experimental import pallas as pl
from jax.experimental.pallas import tpu as pltpu


# ---------------------------------------------------------------------------
# Wavelet_Inter (coif1, level=1, pywt 'symmetric' mode) as an (N, N) matrix.
#   Wavelet_Inter(x) along the node axis == M @ x_node
#   where M = R_lo @ A + 2 * R_hi @ D  (analysis A/D, synthesis R_lo/R_hi)
# ---------------------------------------------------------------------------
_COIF1_DEC_LO = np.array([
    -0.0156557281354645, -0.0727326195128539, 0.3848648468642029,
     0.8525720202122554,  0.3378976624578092, -0.0727326195128539,
], dtype=np.float64)


def wavelet_inter_matrix(n):
    """(N, N) matrix for the coif1 level-1 wavedec/waverec with 2x details.

    Requires even n (otherwise pywt.waverec changes the length)."""
    F = _COIF1_DEC_LO.shape[0]
    dec_lo = _COIF1_DEC_LO
    rec_lo = dec_lo[::-1].copy()
    rec_hi = np.array([(-1.0) ** k * dec_lo[k] for k in range(F)])
    dec_hi = rec_hi[::-1].copy()

    def sym(t):  # pywt 'symmetric' (half-point) boundary extension
        while t < 0 or t >= n:
            t = -t - 1 if t < 0 else 2 * n - 1 - t
        return t

    ncoef = (n + F - 1) // 2                      # pywt dwt output length
    A = np.zeros((ncoef, n))
    Dm = np.zeros((ncoef, n))
    for i in range(ncoef):                        # cA[i] = sum_k h[k] x[2i+1-k]
        for k in range(F):
            t = sym(2 * i + 1 - k)
            A[i, t] += dec_lo[k]
            Dm[i, t] += dec_hi[k]

    rec_len = 2 * ncoef - F + 2                   # pywt idwt output length
    assert rec_len == n, "num_of_node must be even so waverec keeps the length"
    R_lo = np.zeros((n, ncoef))
    R_hi = np.zeros((n, ncoef))
    for m in range(n):                            # x[m] = sum_i c[i] rec[m+F-2-2i]
        for i in range(ncoef):
            idx = m + F - 2 - 2 * i
            if 0 <= idx < F:
                R_lo[m, i] = rec_lo[idx]
                R_hi[m, i] = rec_hi[idx]

    # waverec([cA, 2*cD]) is linear:  M = R_lo A + 2 R_hi D
    M = R_lo @ A + 2.0 * (R_hi @ Dm)
    return M.astype(np.float32)


# ---------------------------------------------------------------------------
# Host-side, once-per-model parameter prep (hoisted out of the jitted forward)
# ---------------------------------------------------------------------------
def _pick_batch_tile(batch, rows_per_batch, target_rows=128, max_rows=512):
    """Batch elements per grid step: fill MXU rows, keep >= 2 grid steps."""
    best = None
    for tb in range(1, batch + 1):
        if batch % tb:
            continue
        rows = tb * rows_per_batch
        if rows % 8 and tb != batch:          # (8, 128) sublane constraint
            continue
        if batch // tb < min(2, batch):       # keep both v7x TCs busy
            continue
        if rows >= target_rows:               # smallest tb reaching the target
            return tb                         #  -> more grid steps / pipelining
        if rows <= max_rows or best is None:
            best = tb
    return best if best is not None else batch


def prepare_encoder_inter_params(M, w1, b1, w2, b2, *, batch, seq_len,
                                 param_dtype=jnp.float32):
    """Pick the batch tile, expand the wavelet mix to the row tile, cast weights.

    param_dtype=jnp.bfloat16 is the MXU-native path on v6e/v7x (accumulation
    stays f32 inside the kernel); biases stay f32 (added post-accumulation).
    """
    M = np.asarray(M, dtype=np.float32)
    num_node = M.shape[0]
    rows_per_batch = num_node * seq_len
    tb = _pick_batch_tile(batch, rows_per_batch)
    # Row order inside a tile is (batch-local, node, seq)  =>  mix matrix is
    # block-diag over batch, M over node, identity over seq.
    mix = np.kron(np.eye(tb, dtype=np.float32),
                  np.kron(M, np.eye(seq_len, dtype=np.float32)))
    params = (
        jnp.asarray(mix, dtype=param_dtype),
        jnp.asarray(np.asarray(w1), dtype=param_dtype),
        jnp.asarray(np.asarray(b1).reshape(1, -1), dtype=jnp.float32),
        jnp.asarray(np.asarray(w2), dtype=param_dtype),
        jnp.asarray(np.asarray(b2).reshape(1, -1), dtype=jnp.float32),
    )
    return params, tb


# ---------------------------------------------------------------------------
# Pallas kernel: fused wavelet mix + Linear/ReLU + Linear/ReLU
# One grid step == TB batch elements; (batch, node, seq) folded into rows.
# ---------------------------------------------------------------------------
def _encoder_inter_kernel(mm_ref, w1_ref, b1_ref, w2_ref, b2_ref, x_ref, o_ref):
    # x_ref : (R, D)   R = TB*N*S rows
    # mm_ref: (R, R)   kron(I_TB, M (x) I_S)  -- wavelet mix along the node axis
    # w1_ref: (D, H)   b1_ref: (1, H)   w2_ref: (H, H)   b2_ref: (1, H)
    x = x_ref[...].astype(mm_ref.dtype)                       # no-op if f32
    y = jnp.dot(mm_ref[...], x, preferred_element_type=jnp.float32)
    h = jnp.dot(y.astype(w1_ref.dtype), w1_ref[...],
                preferred_element_type=jnp.float32)
    h = jnp.maximum(h + b1_ref[...], 0.0)
    o = jnp.dot(h.astype(w2_ref.dtype), w2_ref[...],
                preferred_element_type=jnp.float32)
    o = jnp.maximum(o + b2_ref[...], 0.0)
    o_ref[...] = o.astype(o_ref.dtype)


def encoder_inter_forward(x, mix, w1, b1, w2, b2, *, batch_tile):
    """x: (B, N, S, D) -> (B, N, S, H).  N must be even (see wavelet matrix)."""
    B, N, S, D = x.shape
    H = w1.shape[1]
    R = batch_tile * N * S                       # MXU row tile per grid step
    assert B % batch_tile == 0
    assert mix.shape == (R, R)
    num_steps = B // batch_tile

    x2 = x.reshape(B * N * S, D)                 # free, contiguous reshape

    itemsize_x = np.dtype(x.dtype).itemsize
    param_bytes = sum(int(a.size) * a.dtype.itemsize
                      for a in (mix, w1, b1, w2, b2))
    flops = 2 * (num_steps * R * R * D + B * N * S * D * H + B * N * S * H * H)
    bytes_accessed = int(B * N * S * (D + H) * itemsize_x + param_bytes)

    # Streamed slabs are double-buffered; grid-invariant params resident.
    resident = 2 * R * (D + H) * itemsize_x + 2 * param_bytes
    vmem_limit = int(min(32 * 2**20, max(4 * 2**20, 4 * resident)))

    out = pl.pallas_call(
        _encoder_inter_kernel,
        out_shape=jax.ShapeDtypeStruct((B * N * S, H), x.dtype),
        grid=(num_steps,),
        in_specs=[
            # Grid-invariant operands (constant index_map): DMA'd once,
            # revisited from VMEM on every later step.
            pl.BlockSpec((R, R), lambda i: (0, 0)),    # wavelet mix
            pl.BlockSpec((D, H), lambda i: (0, 0)),    # W1
            pl.BlockSpec((1, H), lambda i: (0, 0)),    # b1
            pl.BlockSpec((H, H), lambda i: (0, 0)),    # W2
            pl.BlockSpec((1, H), lambda i: (0, 0)),    # b2
            # Streamed rows: TB batch elements per step.
            pl.BlockSpec((R, D), lambda i: (i, 0)),    # x rows
        ],
        out_specs=pl.BlockSpec((R, H), lambda i: (i, 0)),
        compiler_params=pltpu.CompilerParams(
            dimension_semantics=("parallel",),         # shard steps over TCs
            vmem_limit_bytes=vmem_limit),
        cost_estimate=pl.CostEstimate(
            flops=flops, transcendentals=0, bytes_accessed=bytes_accessed),
    )(mix, w1, b1, w2, b2, x2)

    return out.reshape(B, N, S, H)                     # free reshape


if __name__ == "__main__":
    # small shapes: batch=8, num_node=8, seq=8, input_dim=4, hidden_dim=32
    B, N, S, D, H = 8, 8, 8, 4, 32

    key = jax.random.PRNGKey(0)
    kx, k1, k2, k3, k4 = jax.random.split(key, 5)
    x = jax.random.normal(kx, (B, N, S, D), dtype=jnp.float32)

    # deterministic parameter init (PyTorch nn.Linear-style uniform bounds)
    bound1 = 1.0 / np.sqrt(D)
    bound2 = 1.0 / np.sqrt(H)
    w1 = jax.random.uniform(k1, (D, H), jnp.float32, -bound1, bound1)
    b1 = jax.random.uniform(k2, (H,), jnp.float32, -bound1, bound1)
    w2 = jax.random.uniform(k3, (H, H), jnp.float32, -bound2, bound2)
    b2 = jax.random.uniform(k4, (H,), jnp.float32, -bound2, bound2)

    M = wavelet_inter_matrix(N)                        # (N, N) float32 numpy

    # pure-JAX reference of the same forward pass
    Mj = jnp.asarray(M)
    y_ref = jnp.einsum("nm,bmsd->bnsd", Mj, x)
    h_ref = jnp.maximum(jnp.einsum("bnsd,dh->bnsh", y_ref, w1) + b1, 0.0)
    o_ref = jnp.maximum(jnp.einsum("bnsh,hk->bnsk", h_ref, w2) + b2, 0.0)

    fwd = jax.jit(encoder_inter_forward, static_argnames=("batch_tile",))

    # f32 weights: exact path
    params32, tb = prepare_encoder_inter_params(
        M, w1, b1, w2, b2, batch=B, seq_len=S, param_dtype=jnp.float32)
    out32 = jax.block_until_ready(fwd(x, *params32, batch_tile=tb))
    assert out32.shape == (B, N, S, H)
    np.testing.assert_allclose(np.asarray(out32), np.asarray(o_ref),
                               rtol=1e-5, atol=1e-5)

    # bf16 weights: MXU-native path on v6e/v7x (f32 accumulation in-kernel)
    params16, tb16 = prepare_encoder_inter_params(
        M, w1, b1, w2, b2, batch=B, seq_len=S, param_dtype=jnp.bfloat16)
    out16 = jax.block_until_ready(fwd(x, *params16, batch_tile=tb16))
    np.testing.assert_allclose(np.asarray(out16), np.asarray(o_ref),
                               rtol=5e-2, atol=5e-2)

    print("KERNEL_OK")
</pallas_src>

<mosaic_0001>
module attributes {stable_mosaic.version = 11 : i64} {
  func.func @_encoder_inter_kernel(%arg0: i32, %arg1: memref<128x128xf32, #tpu.memory_space<vmem>>, %arg2: memref<4x32xf32, #tpu.memory_space<vmem>>, %arg3: memref<1x32xf32, #tpu.memory_space<vmem>>, %arg4: memref<32x32xf32, #tpu.memory_space<vmem>>, %arg5: memref<1x32xf32, #tpu.memory_space<vmem>>, %arg6: memref<128x4xf32, #tpu.memory_space<vmem>>, %arg7: memref<128x32xf32, #tpu.memory_space<vmem>>) attributes {dimension_semantics = [#tpu.dimension_semantics<parallel>], iteration_bounds = array<i64: 4>, scalar_prefetch = 0 : i64, scratch_operands = 0 : i64, tpu.core_type = #tpu.core_type<tc>, window_params = [{pipeline_mode = #tpu.pipeline_mode<synchronous>, transform_indices = @transform_0, window_bounds = array<i64: 128, 128>}, {pipeline_mode = #tpu.pipeline_mode<synchronous>, transform_indices = @transform_1, window_bounds = array<i64: 4, 32>}, {pipeline_mode = #tpu.pipeline_mode<synchronous>, transform_indices = @transform_2, window_bounds = array<i64: 1, 32>}, {pipeline_mode = #tpu.pipeline_mode<synchronous>, transform_indices = @transform_3, window_bounds = array<i64: 32, 32>}, {pipeline_mode = #tpu.pipeline_mode<synchronous>, transform_indices = @transform_4, window_bounds = array<i64: 1, 32>}, {transform_indices = @transform_5, window_bounds = array<i64: 128, 4>}, {transform_indices = @transform_6, window_bounds = array<i64: 128, 32>}]} {
    %c0 = arith.constant 0 : index
    %c0_0 = arith.constant 0 : index
    %0 = vector.load %arg6[%c0, %c0_0] : memref<128x4xf32, #tpu.memory_space<vmem>>, vector<128x4xf32>
    %c0_1 = arith.constant 0 : index
    %c0_2 = arith.constant 0 : index
    %1 = vector.load %arg1[%c0_1, %c0_2] : memref<128x128xf32, #tpu.memory_space<vmem>>, vector<128x128xf32>
    %cst = arith.constant dense<0.000000e+00> : vector<128x4xf32>
    %2 = tpu.matmul %1, %0, %cst {dimension_numbers = #tpu.dot_dimension_numbers<[1], [0], [0], [1], [0, 0, 1, 1], [], []>} : vector<128x128xf32>, vector<128x4xf32>, vector<128x4xf32> -> vector<128x4xf32>
    %c0_3 = arith.constant 0 : index
    %c0_4 = arith.constant 0 : index
    %3 = vector.load %arg2[%c0_3, %c0_4] : memref<4x32xf32, #tpu.memory_space<vmem>>, vector<4x32xf32>
    %cst_5 = arith.constant dense<0.000000e+00> : vector<128x32xf32>
    %4 = tpu.matmul %2, %3, %cst_5 {dimension_numbers = #tpu.dot_dimension_numbers<[1], [0], [0], [1], [0, 0, 1, 1], [], []>} : vector<128x4xf32>, vector<4x32xf32>, vector<128x32xf32> -> vector<128x32xf32>
    %c0_6 = arith.constant 0 : index
    %c0_7 = arith.constant 0 : index
    %5 = vector.load %arg3[%c0_6, %c0_7] : memref<1x32xf32, #tpu.memory_space<vmem>>, vector<1x32xf32>
    %6 = vector.broadcast %5 : vector<1x32xf32> to vector<128x32xf32>
    %7 = arith.addf %4, %6 : vector<128x32xf32>
    %cst_8 = arith.constant 0.000000e+00 : f32
    %8 = vector.broadcast %cst_8 : f32 to vector<128x32xf32>
    %9 = arith.maximumf %7, %8 : vector<128x32xf32>
    %c0_9 = arith.constant 0 : index
    %c0_10 = arith.constant 0 : index
    %10 = vector.load %arg4[%c0_9, %c0_10] : memref<32x32xf32, #tpu.memory_space<vmem>>, vector<32x32xf32>
    %cst_11 = arith.constant dense<0.000000e+00> : vector<128x32xf32>
    %11 = tpu.matmul %9, %10, %cst_11 {dimension_numbers = #tpu.dot_dimension_numbers<[1], [0], [0], [1], [0, 0, 1, 1], [], []>} : vector<128x32xf32>, vector<32x32xf32>, vector<128x32xf32> -> vector<128x32xf32>
    %c0_12 = arith.constant 0 : index
    %c0_13 = arith.constant 0 : index
    %12 = vector.load %arg5[%c0_12, %c0_13] : memref<1x32xf32, #tpu.memory_space<vmem>>, vector<1x32xf32>
    %13 = vector.broadcast %12 : vector<1x32xf32> to vector<128x32xf32>
    %14 = arith.addf %11, %13 : vector<128x32xf32>
    %cst_14 = arith.constant 0.000000e+00 : f32
    %15 = vector.broadcast %cst_14 : f32 to vector<128x32xf32>
    %16 = arith.maximumf %14, %15 : vector<128x32xf32>
    %c0_15 = arith.constant 0 : index
    %c0_16 = arith.constant 0 : index
    %17 = vector.load %arg7[%c0_15, %c0_16] : memref<128x32xf32, #tpu.memory_space<vmem>>, vector<128x32xf32>
    tpu.vector_store %arg7[%c0_15, %c0_16], %16 {strides = array<i32>} : memref<128x32xf32, #tpu.memory_space<vmem>>, vector<128x32xf32>,
    return
  }
  func.func @transform_0(%arg0: i32) -> (i32, i32) {
    %c0_i32 = arith.constant 0 : i32
    %c0_i32_0 = arith.constant 0 : i32
    %c0_i32_1 = arith.constant 0 : i32
    return %c0_i32, %c0_i32_0 : i32, i32
  }
  func.func @transform_1(%arg0: i32) -> (i32, i32) {
    %c0_i32 = arith.constant 0 : i32
    %c0_i32_0 = arith.constant 0 : i32
    %c0_i32_1 = arith.constant 0 : i32
    return %c0_i32, %c0_i32_0 : i32, i32
  }
  func.func @transform_2(%arg0: i32) -> (i32, i32) {
    %c0_i32 = arith.constant 0 : i32
    %c0_i32_0 = arith.constant 0 : i32
    %c0_i32_1 = arith.constant 0 : i32
    return %c0_i32, %c0_i32_0 : i32, i32
  }
  func.func @transform_3(%arg0: i32) -> (i32, i32) {
    %c0_i32 = arith.constant 0 : i32
    %c0_i32_0 = arith.constant 0 : i32
    %c0_i32_1 = arith.constant 0 : i32
    return %c0_i32, %c0_i32_0 : i32, i32
  }
  func.func @transform_4(%arg0: i32) -> (i32, i32) {
    %c0_i32 = arith.constant 0 : i32
    %c0_i32_0 = arith.constant 0 : i32
    %c0_i32_1 = arith.constant 0 : i32
    return %c0_i32, %c0_i32_0 : i32, i32
  }
  func.func @transform_5(%arg0: i32) -> (i32, i32) {
    %c0_i32 = arith.constant 0 : i32
    %c0_i32_0 = arith.constant 0 : i32
    return %arg0, %c0_i32 : i32, i32
  }
  func.func @transform_6(%arg0: i32) -> (i32, i32) {
    %c0_i32 = arith.constant 0 : i32
    %c0_i32_0 = arith.constant 0 : i32
    return %arg0, %c0_i32 : i32, i32
  }
}

</mosaic_0001>

<bundles_post_ra>
// kernel: encoder_inter_forward.1
= control target key start
LH: loop header
LB: loop body
LE: loop exit
PB: predicated region body
PF: predicated region fallthrough
CT: control target
= control target key end

     0   :  { %11 = vsyncpa [#allocation3], 0  ;;  %s1657_s0 = inlined_call_operand.vmem [shape: f32[128,128], index: 0, kind: input, shape index: {}]   ;;  %s1658_s1 = inlined_call_operand.vmem [shape: f32[4,32], index: 1, kind: input, shape index: {}]   ;;  %s1659_s2 = inlined_call_operand.vmem [shape: f32[1,32], index: 2, kind: input, shape index: {}]   ;;  %s1660_s3 = inlined_call_operand.vmem [shape: f32[32,32], index: 3, kind: input, shape index: {}]   ;;  %s1661_s4 = inlined_call_operand.vmem [shape: f32[1,32], index: 4, kind: input, shape index: {}]   ;;  %s1662_s5 = inlined_call_operand.vmem [shape: f32[512,4], index: 5, kind: input, shape index: {}]   ;;  %s1663_s6 = inlined_call_operand.hbm [shape: f32[512,32], index: 6, kind: output, shape index: {}]  }
   0x1   :  { %13 = vsyncpa [#allocation3 + $0x1], 0  ;;  %s1379_s21 = smov 0   ;;  %s1381_s22 = smov 0  }
   0x2   :  { %s1383_s23 = smov 0   ;;  %s1385_s24 = smov 0  }
   0x3 LB: > { %s1400_s25 = sadd.s32 4294967295, %s1339_s24   ;;  %s965_s26 = sadd.s32 4294967294, %s1339_s24   ;;  %s1339_s24 = sphi %s1385_s24, %s1669_s24   ;;  %s1335_s23 = sphi %s1383_s23, %s1668_s23   ;;  %s1331_s22 = sphi %s1381_s22, %s1667_s22   ;;  %s1327_s21 = sphi %s1379_s21, %s1666_s21  }
   0x4   : > { %s1404_s27 = sadd.s32 1, %s1339_s24   ;;  %s157_s28 = sadd.s32 1, %s1335_s23 }
   0x5   : > { %s154_s29 = ssub.s32 %s1339_s24, %s1404_s27  ;;  %p167_p0 = scmp.ne.s32.totalorder %s1335_s23, %s1331_s22 }
   0x6   : > { %p155_p1 = scmp.eq.s32.totalorder %s154_s29, 0  ;;  %p168_p2 = scmp.eq.s32.totalorder %s1400_s25, 3 }
   0x7   : > { %p173_p3 = scmp.ne.s32.totalorder %s1331_s22, %s1327_s21  ;;  %p174_p4 = scmp.eq.s32.totalorder %s965_s26, 3 }
   0x8   : > { %s1415_s30 = scalar_select %p155_p1, %s1335_s23, %s157_s28  }
   0x9   : > { %p1417_p5 = por %p168_p2, %p167_p0  ;;  %p1421_p6 = por %p174_p4, %p173_p3 }
   0xa   : > { %p968_p7 = scmp.ge.s32.totalorder %s1339_s24, 1  ;;  %p216_p8 = scmp.lt.s32.totalorder %s1339_s24, 5 }
   0xc   : > { %p217_p9 = pnand %p968_p7, %p216_p8 }
   0xd   : > { %s970_s9 = sshll.u32 (!%p217_p9), %s1400_s25, 4  ;;  %v269_v0 = vld [vmem:[%s1657_s0] sm:$0xff] (!%p217_p9)  ;;  %v270_v25 = vld [vmem:[%s1657_s0 + $0x8] sm:$0xff] (!%p217_p9)  ;;  %v271_v26 = vld [vmem:[%s1657_s0 + $0x10] sm:$0xff] (!%p217_p9)  ;;  %vm487_vm0 = vcmask (!%p217_p9), 1043456   ;;  %vm438_vm1 = vcmask (!%p217_p9), 31744  }
   0xe   : > { %220 = sbr.rel (%p217_p9) target bundleno = 751 (0x2ef), region = 44  ;;  %p247_p10 = scmp.lt.s32.totalorder (!%p217_p9), %s970_s9, 63  ;;  %1114 = vmatprep.mubr.f32.mxu0 (!%p217_p9), %v269_v0  ;;  %v272_v27 = vld [vmem:[%s1657_s0 + $0x18] sm:$0xff] (!%p217_p9)  ;;  %v273_v28 = vld [vmem:[%s1657_s0 + $0x20] sm:$0xff] (!%p217_p9)  ;;  %v274_v29 = vld [vmem:[%s1657_s0 + $0x28] sm:$0xff] (!%p217_p9)  ;;  %vm663_vm2 = vcmask (!%p217_p9), 261120  }
   0xf   : > { %v275_v30 = vld [vmem:[%s1657_s0 + $0x30] sm:$0xff] (!%p217_p9)  ;;  %v276_v31 = vld [vmem:[%s1657_s0 + $0x38] sm:$0xff] (!%p217_p9)  ;;  %v277_v32 = vld [vmem:[%s1657_s0 + $0x40] sm:$0xff] (!%p217_p9)  ;;  %s243_s13 = sand.u32 (!%p217_p9), 1, %s1331_s22   ;;  %s1012_s18 = sshll.u32 (!%p217_p9), %s1400_s25, 11 }
  0x10   : > { %v278_v33 = vld [vmem:[%s1657_s0 + $0x48] sm:$0xff] (!%p217_p9)  ;;  %v279_v34 = vld [vmem:[%s1657_s0 + $0x50] sm:$0xff] (!%p217_p9)  ;;  %v280_v35 = vld [vmem:[%s1657_s0 + $0x58] sm:$0xff] (!%p217_p9)  ;;  %s969_s16 = sshll.u32 (!%p217_p9), %s243_s13, 7  ;;  %s1606_s28 = scalar_lea.hbm (!%p217_p9), %s1663_s6, %s1012_s18 }
  0x11   : > { %v281_v36 = vld [vmem:[%s1657_s0 + $0x60] sm:$0xff] (!%p217_p9)  ;;  %v282_v37 = vld [vmem:[%s1657_s0 + $0x68] sm:$0xff] (!%p217_p9)  ;;  %v283_v38 = vld [vmem:[%s1657_s0 + $0x70] sm:$0xff] (!%p217_p9)  ;;  %s1557_s17 = scalar_lea.vmem (!%p217_p9), [#allocation2], %s969_s16  ;;  %s1616_s25 = scalar_lea.sflag (!%p217_p9), [#allocation3], %s243_s13 }
  0x12   : > { %v284_v39 = vld [vmem:[%s1657_s0 + $0x78] sm:$0xff] (!%p217_p9)  ;;  %v430_v40 = vld [vmem:[%s1658_s1] sm:$0xf] (!%p217_p9)  ;;  %v653_v42 = vld [vmem:[%s1660_s3 + $0x8] sm:$0xff] (!%p217_p9)  ;;  %s903_s19 = sshll.u32 (!%p217_p9), %s1557_s17, 4  ;;  %s1608_s19 = int_to_ptr.vmem [resolvable:$true] %s903_s19 }
  0x13   : > { %1138 = vmatprep.subr.msk.mxu1 (!%p217_p9), %vm487_vm0, %v430_v40  ;;  %v652_v41 = vld [vmem:[%s1660_s3] sm:$0xff] (!%p217_p9)  ;;  %v654_v44 = vld [vmem:[%s1660_s3 + $0x10] sm:$0xff] (!%p217_p9)  ;;  %v655_v45 = vld [vmem:[%s1660_s3 + $0x18] sm:$0xff] (!%p217_p9)  ;;  %s1277_s29 = scalar_lea.vmem (!%p217_p9), %s1608_s19, 2048 }
  0x14   : > { %1139 = vmatpush3.msk.msra.mxu1 (!%p217_p9), %vm487_vm0, %v430_v40  ;;  %v1228_v43 = vpack.c.bf16 (!%p217_p9), %v653_v42, %v652_v41  ;;  %v1232_v48 = vpack.c.bf16 (!%p217_p9), %v655_v45, %v654_v44  ;;  %v972_v63 = vld [vmem:[%s1659_s2] ss:$0 sm:$0xff] (!%p217_p9)  ;;  %p1278_p11 = scmp.ne.s32.totalorder (!%p217_p9), %s1608_s19, %s1277_s29 }
  0x15   : > { %s1671_s9 = smov (!%p247_p10, %s970_s9), 63 }
  0x16   : > { %s971_s12 = sshll.u32 %s1671_s9, 3  ;;  %1229 = vmatprep.subr.bf16.mxu1 %v1228_v43  ;;  %p1279_p12 = pnand %p1278_p11, %p1417_p5 }
  0x17   : > { %s1434_s15 = scalar_lea.vmem %s1662_s5, %s971_s12  ;;  %s1341_s9 = smov [#allocation2]  }
  0x18   : > { %v253_v1 = vld [vmem:[%s1434_s15] sm:$0xff]  ;;  %v254_v2 = vld [vmem:[%s1434_s15 + $0x8] sm:$0xff]  ;;  %v255_v3 = vld [vmem:[%s1434_s15 + $0x10] sm:$0xff]  ;;  %p1280_p13 = pneg %p1279_p12  ;;  %s1281_s10 = sshll.u32 %s1341_s9, 4  ;;  %s1282_s10 = int_to_ptr.vmem [resolvable:$false] %s1281_s10 }
  0x19   : > { %v1196_v4 = vpack.c.bf16 %v254_v2, %v253_v1  ;;  %v256_v5 = vld [vmem:[%s1434_s15 + $0x18] sm:$0xff]  ;;  %v257_v7 = vld [vmem:[%s1434_s15 + $0x20] sm:$0xff]  ;;  %v258_v8 = vld [vmem:[%s1434_s15 + $0x28] sm:$0xff]  ;;  %s1283_s11 = scalar_lea.vmem %s1282_s10, 4096  ;;  %p1284_p0 = scmp.lt.s32.totalorder %s1608_s19, %s1282_s10 }
  0x1a   : > { %v1200_v6 = vpack.c.bf16 %v256_v5, %v255_v3  ;;  %v1204_v9 = vpack.c.bf16 %v258_v8, %v257_v7  ;;  %v259_v10 = vld [vmem:[%s1434_s15 + $0x30] sm:$0xff]  ;;  %v260_v11 = vld [vmem:[%s1434_s15 + $0x38] sm:$0xff]  ;;  %v261_v13 = vld [vmem:[%s1434_s15 + $0x40] sm:$0xff]  ;;  %p1285_p1 = scmp.lt.s32.totalorder %s1283_s11, %s1277_s29 }
  0x1b   : > { %1197 = vmatprep.subr.bf16.mxu0 %v1196_v4  ;;  %v1208_v12 = vpack.c.bf16 %v260_v11, %v259_v10  ;;  %v262_v14 = vld [vmem:[%s1434_s15 + $0x48] sm:$0xff]  ;;  %v263_v16 = vld [vmem:[%s1434_s15 + $0x50] sm:$0xff]  ;;  %v264_v17 = vld [vmem:[%s1434_s15 + $0x58] sm:$0xff] }
  0x1c   : > { %1199 = vmatpush3.bf16.msra.mxu0 %v1196_v4  ;;  %v1212_v15 = vpack.c.bf16 %v262_v14, %v261_v13  ;;  %v1216_v18 = vpack.c.bf16 %v264_v17, %v263_v16  ;;  %v265_v19 = vld [vmem:[%s1434_s15 + $0x60] sm:$0xff]  ;;  %v266_v20 = vld [vmem:[%s1434_s15 + $0x68] sm:$0xff]  ;;  %v267_v22 = vld [vmem:[%s1434_s15 + $0x70] sm:$0xff]  ;;  %p1286_p2 = por %p1285_p1, %p1284_p0 }
  0x1d   : > { %1201 = vmatprep.subr.bf16.mxu0 %v1200_v6  ;;  %v1220_v21 = vpack.c.bf16 %v266_v20, %v265_v19  ;;  %v268_v23 = vld [vmem:[%s1434_s15 + $0x78] sm:$0xff] }
  0x1e   : > { %v1224_v24 = vpack.c.bf16 %v268_v23, %v267_v22  ;;  %p1287_p3 = pnand %p1286_p2, %p1280_p13 }
  0x20   : > { %1203 = vmatpush3.bf16.msra.mxu0 %v1200_v6 }
  0x21   : > { %1205 = vmatprep.subr.bf16.mxu0 %v1204_v9 }
  0x24   : > { %1207 = vmatpush3.bf16.msra.mxu0 %v1204_v9 }
  0x25   : > { %1209 = vmatprep.subr.bf16.mxu0 %v1208_v12 }
  0x28   : > { %1211 = vmatpush3.bf16.msra.mxu0 %v1208_v12 }
  0x29   : > { %1213 = vmatprep.subr.bf16.mxu0 %v1212_v15 }
  0x2c   : > { %1215 = vmatpush3.bf16.msra.mxu0 %v1212_v15 }
  0x2d   : > { %1217 = vmatprep.subr.bf16.mxu0 %v1216_v18 }
  0x30   : > { %1219 = vmatpush3.bf16.msra.mxu0 %v1216_v18 }
  0x31   : > { %1221 = vmatprep.subr.bf16.mxu0 %v1220_v21 }
  0x34   : > { %1223 = vmatpush3.bf16.msra.mxu0 %v1220_v21 }
  0x35   : > { %1225 = vmatprep.subr.bf16.mxu0 %v1224_v24 }
  0x38   : > { %1227 = vmatpush3.bf16.msra.mxu0 %v1224_v24 }
  0x3b   : > { %1115 = vmatmul.mubr.f32.vlgmr.msra.gmra.mrb[0].mxu0 %v270_v25 }
  0x3c   : > { %1117 = vmatprep.mubr.f32.mxu0 %v271_v26 }
  0x3f   : > { %1118 = vmatmul.mubr.f32.gmra.mrb[2].mxu0 %v272_v27 }
  0x40   : > { %1120 = vmatprep.mubr.f32.mxu0 %v273_v28 }
  0x43   : > { %1121 = vmatmul.mubr.f32.gmra.mrb[4].mxu0 %v274_v29 }
  0x44   : > { %1123 = vmatprep.mubr.f32.mxu0 %v275_v30 }
  0x47   : > { %1124 = vmatmul.mubr.f32.gmra.mrb[6].mxu0 %v276_v31 }
  0x48   : > { %1126 = vmatprep.mubr.f32.mxu0 %v277_v32 }
  0x4b   : > { %1127 = vmatmul.mubr.f32.gmra.mrb[8].mxu0 %v278_v33 }
  0x4c   : > { %1129 = vmatprep.mubr.f32.mxu0 %v279_v34 }
  0x4f   : > { %1130 = vmatmul.mubr.f32.gmra.mrb[10].mxu0 %v280_v35 }
  0x50   : > { %1132 = vmatprep.mubr.f32.mxu0 %v281_v36 }
  0x53   : > { %1133 = vmatmul.mubr.f32.gmra.mrb[12].mxu0 %v282_v37 }
  0x54   : > { %1135 = vmatprep.mubr.f32.mxu0 %v283_v38 }
  0x57   : > { %1136 = vmatmul.mubr.f32.gmra.mrb[14].mxu0 %v284_v39 }
 0x10e   : > { %v1116_v46 = vpop.f32.mrb[0].mxu0 }
 0x10f   : > { %v351_v47 = vpop.f32.mrb[1].mxu0 }
 0x110   : > { %1140 = vmatprep.mubr.msk.f32.mxu1 %vm438_vm1, %v351_v47 }
 0x111   : > { %1141 = vmatmul.mubr.msk.f32.vlgmr.msra.gmra.mrb[0].mxu1 %vm438_vm1, %v1116_v46 }
 0x112   : > { %v1119_v49 = vpop.f32.mrb[2].mxu0  ;;  %1231 = vmatpush3.bf16.msra.mxu1 %v1228_v43 }
 0x113   : > { %v361_v50 = vpop.f32.mrb[3].mxu0  ;;  %1233 = vmatprep.subr.bf16.mxu1 %v1232_v48 }
 0x114   : > { %1143 = vmatprep.mubr.msk.f32.mxu1 %vm438_vm1, %v361_v50 }
 0x115   : > { %1144 = vmatmul.mubr.msk.f32.gmra.mrb[2].mxu1 %vm438_vm1, %v1119_v49 }
 0x116   : > { %v1122_v51 = vpop.f32.mrb[4].mxu0  ;;  %1235 = vmatpush3.bf16.msra.mxu1 %v1232_v48  ;;  %v1551_v48 = vld [vmem:[%s1661_s4] ss:$0 sm:$0xff] }
 0x117   : > { %v371_v52 = vpop.f32.mrb[5].mxu0 }
 0x118   : > { %1146 = vmatprep.mubr.msk.f32.mxu1 %vm438_vm1, %v371_v52 }
 0x119   : > { %1147 = vmatmul.mubr.msk.f32.gmra.mrb[4].mxu1 %vm438_vm1, %v1122_v51 }
 0x11a   : > { %v1125_v53 = vpop.f32.mrb[6].mxu0 }
 0x11b   : > { %v381_v54 = vpop.f32.mrb[7].mxu0 }
 0x11c   : > { %1149 = vmatprep.mubr.msk.f32.mxu1 %vm438_vm1, %v381_v54 }
 0x11d   : > { %1150 = vmatmul.mubr.msk.f32.gmra.mrb[6].mxu1 %vm438_vm1, %v1125_v53 }
 0x11e   : > { %v1128_v55 = vpop.f32.mrb[8].mxu0 }
 0x11f   : > { %v391_v56 = vpop.f32.mrb[9].mxu0 }
 0x120   : > { %1152 = vmatprep.mubr.msk.f32.mxu1 %vm438_vm1, %v391_v56 }
 0x121   : > { %1153 = vmatmul.mubr.msk.f32.gmra.mrb[8].mxu1 %vm438_vm1, %v1128_v55 }
 0x122   : > { %v1131_v57 = vpop.f32.mrb[10].mxu0 }
 0x123   : > { %v401_v58 = vpop.f32.mrb[11].mxu0 }
 0x124   : > { %1155 = vmatprep.mubr.msk.f32.mxu1 %vm438_vm1, %v401_v58 }
 0x125   : > { %1156 = vmatmul.mubr.msk.f32.gmra.mrb[10].mxu1 %vm438_vm1, %v1131_v57 }
 0x126   : > { %v1134_v59 = vpop.f32.mrb[12].mxu0 }
 0x127   : > { %v411_v60 = vpop.f32.mrb[13].mxu0 }
 0x128   : > { %1158 = vmatprep.mubr.msk.f32.mxu1 %vm438_vm1, %v411_v60 }
 0x129   : > { %1159 = vmatmul.mubr.msk.f32.gmra.mrb[12].mxu1 %vm438_vm1, %v1134_v59 }
 0x12a   : > { %v1137_v61 = vpop.f32.mrb[14].mxu0 }
 0x12b   : > { %v421_v62 = vpop.f32.mrb[15].mxu0 }
 0x12c   : > { %1161 = vmatprep.mubr.msk.f32.mxu1 %vm438_vm1, %v421_v62 }
 0x12d   : > { %1162 = vmatmul.mubr.msk.f32.gmra.mrb[14].mxu1 %vm438_vm1, %v1137_v61 }
 0x1e4   : > { %v1142_v0 = vpop.f32.mrb[0].mxu1 }
 0x1e5   : > { %v563_v1 = vadd.f32 %v1142_v0, %v972_v63  ;;  %v557_v2 = vpop.f32.mrb[1].mxu1 }
 0x1e6   : > { %v558_v3 = vadd.f32 %v972_v63, %v557_v2 }
 0x1e7   : > { %v637_v6 = vmax.f32 %v563_v1, 0.0 }
 0x1e8   : > { %v636_v4 = vmax.f32 %v558_v3, 0.0  ;;  %v1145_v5 = vpop.f32.mrb[2].mxu1 }
 0x1e9   : > { %v573_v7 = vadd.f32 %v1145_v5, %v972_v63  ;;  %v567_v8 = vpop.f32.mrb[3].mxu1 }
 0x1ea   : > { %v568_v9 = vadd.f32 %v972_v63, %v567_v8  ;;  %1172 = vmatprep.mubr.msk.f32.mxu1 %vm663_vm2, %v636_v4 }
 0x1eb   : > { %1173 = vmatmul.mubr.msk.f32.vlgmr.msra.gmra.mrb[16].mxu1 %vm663_vm2, %v637_v6  ;;  %v639_v12 = vmax.f32 %v573_v7, 0.0 }
 0x1ec   : > { %v638_v10 = vmax.f32 %v568_v9, 0.0  ;;  %v1148_v11 = vpop.f32.mrb[4].mxu1 }
 0x1ed   : > { %v583_v13 = vadd.f32 %v1148_v11, %v972_v63  ;;  %v577_v14 = vpop.f32.mrb[5].mxu1 }
 0x1ee   : > { %v578_v15 = vadd.f32 %v972_v63, %v577_v14  ;;  %1175 = vmatprep.mubr.msk.f32.mxu1 %vm663_vm2, %v638_v10 }
 0x1ef   : > { %1176 = vmatmul.mubr.msk.f32.gmra.mrb[18].mxu1 %vm663_vm2, %v639_v12  ;;  %v641_v18 = vmax.f32 %v583_v13, 0.0 }
 0x1f0   : > { %v640_v16 = vmax.f32 %v578_v15, 0.0  ;;  %v1151_v17 = vpop.f32.mrb[6].mxu1 }
 0x1f1   : > { %v593_v19 = vadd.f32 %v1151_v17, %v972_v63  ;;  %v587_v20 = vpop.f32.mrb[7].mxu1 }
 0x1f2   : > { %v588_v21 = vadd.f32 %v972_v63, %v587_v20  ;;  %1178 = vmatprep.mubr.msk.f32.mxu1 %vm663_vm2, %v640_v16 }
 0x1f3   : > { %1179 = vmatmul.mubr.msk.f32.gmra.mrb[20].mxu1 %vm663_vm2, %v641_v18  ;;  %v643_v24 = vmax.f32 %v593_v19, 0.0 }
 0x1f4   : > { %v642_v22 = vmax.f32 %v588_v21, 0.0  ;;  %v1154_v23 = vpop.f32.mrb[8].mxu1 }
 0x1f5   : > { %v603_v25 = vadd.f32 %v1154_v23, %v972_v63  ;;  %v597_v26 = vpop.f32.mrb[9].mxu1 }
 0x1f6   : > { %v598_v27 = vadd.f32 %v972_v63, %v597_v26  ;;  %1181 = vmatprep.mubr.msk.f32.mxu1 %vm663_vm2, %v642_v22 }
 0x1f7   : > { %1182 = vmatmul.mubr.msk.f32.gmra.mrb[22].mxu1 %vm663_vm2, %v643_v24  ;;  %v645_v30 = vmax.f32 %v603_v25, 0.0 }
 0x1f8   : > { %v644_v28 = vmax.f32 %v598_v27, 0.0  ;;  %v1157_v29 = vpop.f32.mrb[10].mxu1 }
 0x1f9   : > { %v613_v31 = vadd.f32 %v1157_v29, %v972_v63  ;;  %v607_v32 = vpop.f32.mrb[11].mxu1 }
 0x1fa   : > { %v608_v33 = vadd.f32 %v972_v63, %v607_v32  ;;  %1184 = vmatprep.mubr.msk.f32.mxu1 %vm663_vm2, %v644_v28 }
 0x1fb   : > { %1185 = vmatmul.mubr.msk.f32.gmra.mrb[24].mxu1 %vm663_vm2, %v645_v30  ;;  %v647_v36 = vmax.f32 %v613_v31, 0.0 }
 0x1fc   : > { %v646_v34 = vmax.f32 %v608_v33, 0.0  ;;  %v1160_v35 = vpop.f32.mrb[12].mxu1 }
 0x1fd   : > { %v623_v37 = vadd.f32 %v1160_v35, %v972_v63  ;;  %v617_v38 = vpop.f32.mrb[13].mxu1 }
 0x1fe   : > { %v618_v39 = vadd.f32 %v972_v63, %v617_v38  ;;  %1187 = vmatprep.mubr.msk.f32.mxu1 %vm663_vm2, %v646_v34 }
 0x1ff   : > { %1188 = vmatmul.mubr.msk.f32.gmra.mrb[26].mxu1 %vm663_vm2, %v647_v36  ;;  %v649_v42 = vmax.f32 %v623_v37, 0.0 }
 0x200   : > { %v648_v40 = vmax.f32 %v618_v39, 0.0  ;;  %v1163_v41 = vpop.f32.mrb[14].mxu1 }
 0x201   : > { %v633_v43 = vadd.f32 %v1163_v41, %v972_v63  ;;  %v627_v44 = vpop.f32.mrb[15].mxu1 }
 0x202   : > { %v628_v45 = vadd.f32 %v972_v63, %v627_v44  ;;  %1190 = vmatprep.mubr.msk.f32.mxu1 %vm663_vm2, %v648_v40 }
 0x203   : > { %1191 = vmatmul.mubr.msk.f32.gmra.mrb[28].mxu1 %vm663_vm2, %v649_v42  ;;  %v651_v47 = vmax.f32 %v633_v43, 0.0 }
 0x204   : > { %v650_v46 = vmax.f32 %v628_v45, 0.0 }
 0x206   : > { %1193 = vmatprep.mubr.msk.f32.mxu1 %vm663_vm2, %v650_v46 }
 0x207   : > { %1194 = vmatmul.mubr.msk.f32.gmra.mrb[30].mxu1 %vm663_vm2, %v651_v47 }
 0x2be   : > { %v1174_v49 = vpop.f32.mrb[16].mxu1 }
 0x2bf   : > { %v784_v50 = vadd.f32 %v1174_v49, %v1551_v48  ;;  %v778_v51 = vpop.f32.mrb[17].mxu1 }
 0x2c0   : > { %v779_v52 = vadd.f32 %v1551_v48, %v778_v51 }
 0x2c1   : > { %v858_v53 = vmax.f32 %v784_v50, 0.0 }
 0x2c2   : > { %v857_v54 = vmax.f32 %v779_v52, 0.0  ;;  %v1177_v55 = vpop.f32.mrb[18].mxu1 }
 0x2c3   : > { %874 = vst.msk [vmem:[%s1557_s17 + $0x8] sm:$0xff] %vm663_vm2, %v858_v53  ;;  %v794_v56 = vadd.f32 %v1177_v55, %v1551_v48  ;;  %v788_v57 = vpop.f32.mrb[19].mxu1 }
 0x2c4   : > { %873 = vst.msk [vmem:[%s1557_s17] sm:$0xff] %vm663_vm2, %v857_v54  ;;  %v789_v58 = vadd.f32 %v1551_v48, %v788_v57 }
 0x2c5   : > { %v860_v59 = vmax.f32 %v794_v56, 0.0 }
 0x2c6   : > { %v859_v60 = vmax.f32 %v789_v58, 0.0  ;;  %v1180_v61 = vpop.f32.mrb[20].mxu1 }
 0x2c7   : > { %876 = vst.msk [vmem:[%s1557_s17 + $0x18] sm:$0xff] %vm663_vm2, %v860_v59  ;;  %v804_v62 = vadd.f32 %v1180_v61, %v1551_v48  ;;  %v798_v63 = vpop.f32.mrb[21].mxu1 }
 0x2c8   : > { %875 = vst.msk [vmem:[%s1557_s17 + $0x10] sm:$0xff] %vm663_vm2, %v859_v60  ;;  %v799_v0 = vadd.f32 %v1551_v48, %v798_v63 }
 0x2c9   : > { %v862_v1 = vmax.f32 %v804_v62, 0.0 }
 0x2ca   : > { %v861_v2 = vmax.f32 %v799_v0, 0.0  ;;  %v1183_v3 = vpop.f32.mrb[22].mxu1 }
 0x2cb   : > { %878 = vst.msk [vmem:[%s1557_s17 + $0x28] sm:$0xff] %vm663_vm2, %v862_v1  ;;  %v814_v4 = vadd.f32 %v1183_v3, %v1551_v48  ;;  %v808_v5 = vpop.f32.mrb[23].mxu1 }
 0x2cc   : > { %877 = vst.msk [vmem:[%s1557_s17 + $0x20] sm:$0xff] %vm663_vm2, %v861_v2  ;;  %v809_v6 = vadd.f32 %v1551_v48, %v808_v5 }
 0x2cd   : > { %v864_v7 = vmax.f32 %v814_v4, 0.0 }
 0x2ce   : > { %v863_v8 = vmax.f32 %v809_v6, 0.0  ;;  %v1186_v9 = vpop.f32.mrb[24].mxu1 }
 0x2cf   : > { %880 = vst.msk [vmem:[%s1557_s17 + $0x38] sm:$0xff] %vm663_vm2, %v864_v7  ;;  %v824_v10 = vadd.f32 %v1186_v9, %v1551_v48  ;;  %v818_v11 = vpop.f32.mrb[25].mxu1 }
 0x2d0   : > { %879 = vst.msk [vmem:[%s1557_s17 + $0x30] sm:$0xff] %vm663_vm2, %v863_v8  ;;  %v819_v12 = vadd.f32 %v1551_v48, %v818_v11 }
 0x2d1   : > { %v866_v13 = vmax.f32 %v824_v10, 0.0 }
 0x2d2   : > { %v865_v14 = vmax.f32 %v819_v12, 0.0  ;;  %v1189_v15 = vpop.f32.mrb[26].mxu1 }
 0x2d3   : > { %882 = vst.msk [vmem:[%s1557_s17 + $0x48] sm:$0xff] %vm663_vm2, %v866_v13  ;;  %v834_v16 = vadd.f32 %v1189_v15, %v1551_v48  ;;  %v828_v17 = vpop.f32.mrb[27].mxu1 }
 0x2d4   : > { %881 = vst.msk [vmem:[%s1557_s17 + $0x40] sm:$0xff] %vm663_vm2, %v865_v14  ;;  %v829_v18 = vadd.f32 %v1551_v48, %v828_v17 }
 0x2d5   : > { %v868_v19 = vmax.f32 %v834_v16, 0.0 }
 0x2d6   : > { %v867_v20 = vmax.f32 %v829_v18, 0.0  ;;  %v1192_v21 = vpop.f32.mrb[28].mxu1 }
 0x2d7   : > { %884 = vst.msk [vmem:[%s1557_s17 + $0x58] sm:$0xff] %vm663_vm2, %v868_v19  ;;  %v844_v22 = vadd.f32 %v1192_v21, %v1551_v48  ;;  %v838_v23 = vpop.f32.mrb[29].mxu1 }
 0x2d8   : > { %883 = vst.msk [vmem:[%s1557_s17 + $0x50] sm:$0xff] %vm663_vm2, %v867_v20  ;;  %v839_v24 = vadd.f32 %v1551_v48, %v838_v23 }
 0x2d9   : > { %v870_v25 = vmax.f32 %v844_v22, 0.0 }
 0x2da   : > { %v869_v26 = vmax.f32 %v839_v24, 0.0  ;;  %v1195_v27 = vpop.f32.mrb[30].mxu1 }
 0x2db   : > { %886 = vst.msk [vmem:[%s1557_s17 + $0x68] sm:$0xff] %vm663_vm2, %v870_v25  ;;  %v854_v28 = vadd.f32 %v1195_v27, %v1551_v48  ;;  %v848_v29 = vpop.f32.mrb[31].mxu1 }
 0x2dc   : > { %885 = vst.msk [vmem:[%s1557_s17 + $0x60] sm:$0xff] %vm663_vm2, %v869_v26  ;;  %v849_v30 = vadd.f32 %v1551_v48, %v848_v29 }
 0x2dd   : > { %v872_v31 = vmax.f32 %v854_v28, 0.0 }
 0x2de   : > { %v871_v32 = vmax.f32 %v849_v30, 0.0 }
 0x2df   : > { %888 = vst.msk [vmem:[%s1557_s17 + $0x78] sm:$0xff] %vm663_vm2, %v872_v31 }
 0x2e0   : > { %887 = vst.msk [vmem:[%s1557_s17 + $0x70] sm:$0xff] %vm663_vm2, %v871_v32 }
 0x2e1   : > { %1290 = shalt.err (!%p1287_p3)
}
 0x2e2   : > { %s1291_s12 = scalar_lea.hbm %s1606_s28, 2048  ;;  %s1295_s15 = scalar_lea.hbm %s1663_s6, 8192 }
 0x2e3   : > { %p1292_p4 = scmp.ne.s32.totalorder %s1606_s28, %s1291_s12  ;;  %p1296_p9 = scmp.lt.u32.totalorder %s1606_s28, %s1663_s6 }
 0x2e4   : > { %p1297_p10 = scmp.lt.u32.totalorder %s1295_s15, %s1291_s12  ;;  %p1299_p12 = scmp.lt.u32.totalorder %s1291_s12, %s1606_s28 }
 0x2e5   : > { %p1293_p7 = pnand %p1292_p4, %p1417_p5 }
 0x2e6   : > { %p1298_p11 = por %p1297_p10, %p1296_p9 }
 0x2e7   : > { %p1294_p8 = pneg %p1293_p7 }
 0x2e8   : > { %p1300_p13 = por %p1299_p12, %p1298_p11 }
 0x2ea   : > { %p1301_p0 = pnand %p1300_p13, %p1294_p8 }
 0x2ec   : > { %1304 = shalt.err (!%p1301_p0)
}
 0x2ed   : > { %s1342_s18 = smov 128   ;;  %s1343_s20 = smov 8  }
 0x2ee   : > { %1236 = dma.vmem_to_hbm [thread:$0]  (%p1417_p5), %s1608_s19, 2048, %s1606_s28, %s1616_s25, %s1342_s18, %s1342_s18, %s1343_s20  }
 0x2ef PF: > { %p1242_p1 = scmp.ge.s32.totalorder %s1339_s24, 2  ;;  %s918_s26 = sand.u32 1, %s1327_s21  }
 0x2f0   : > { %s919_s29 = scalar_lea.sflag [#allocation3], %s918_s26 }
 0x2f1   : > { %p1239_p2 = pnand %p1242_p1, %p1421_p6 }
 0x2f3   : > { %1322 = dma.done.wait (!%p1239_p2), %s919_s29, 2048  }
 0x2f4   : > { %1324 = vsyncadd (!%p1239_p2), %s919_s29, 4294965248  ;;  %p16_p3 = scmp.ge.s32.totalorder %s1404_s27, 6   ;;  %s1666_s21 = smov %s1331_s22 }
 0x2f5   : > { %s1667_s22 = smov %s1335_s23  ;;  %s1668_s23 = smov %s1415_s30 }
 0x2f6   : > { %s1669_s24 = smov %s1404_s27  ;;  %18 = sbr.rel (!%p16_p3) target bundleno = 3 (0x3), region = 79 }
 0x2fd   :  { %924 = vsyncpa [#allocation3], 1 }
 0x2fe   :  { %926 = vsyncpa [#allocation3 + $0x1], 1 }

</bundles_post_ra>
